<compile_context>
chip_gen: v7x
topology: tpu7x:2x2x1
jax: 0.10.0
libtpu: 0.0.40
codegen_flags: <defaults>
</compile_context>

<pallas_src>
import jax
import jax.numpy as jnp
from jax.experimental import pallas as pl
from jax.experimental.pallas import tpu as pltpu

BN_EPS = 1e-5


def depth_gcn_fused_kernel(x_ref, att_ref, diag_ref, w_ref, b_ref,
                           gamma_ref, beta_ref, out_ref):
    # x:     [BJ, Cin_pad]       f32, first-layer input (channels zero-padded)
    # att:   [BJ, BJ]            bf16, block-diagonal attention
    # diag:  [BJ, 1]             f32, diag(att) in row order matching x
    # w:     [L, Cin_pad, 2*Cp]  bf16, self|others weights concatenated
    # b:     [L, 1, 2*Cp]        f32, self|others biases concatenated
    # gamma/beta: [L, 1, Cp]     f32 (zero-padded beyond the real Cout)
    # out:   [BJ, Cp]            f32, lane-dense (Cp = round_up(Cout, 128))
    BJ, cin_pad = x_ref.shape
    L = w_ref.shape[0]
    cp = gamma_ref.shape[-1]
    inv_n = 1.0 / BJ

    att = att_ref[...]                       # bf16 MXU operand
    dg = diag_ref[...]                       # [BJ, 1] f32

    h = x_ref[...].astype(jnp.bfloat16)      # [BJ, cin_pad]
    # L is small and static: keep the Python unroll.
    # TODO(synk): switch to lax.fori_loop with dynamic w_ref[l] indexing if
    # n_layers ever grows large (bounds live ranges / compile time).
    for l in range(L):
        w_l = w_ref[l]                       # [cin_pad, 2*cp] bf16
        if h.shape[-1] < w_l.shape[0]:       # static; only when cin_pad > cp
            w_l = w_l[:h.shape[-1], :]       # 128-aligned static slice: free

        # Fused self|others 1x1 conv: ONE MXU pass, lane-dense N = 2*Cp.
        feat = jnp.dot(h, w_l, preferred_element_type=jnp.float32) + b_ref[l]
        f_self = feat[:, :cp]
        f_other = feat[:, cp:]

        # Attention aggregation: block-diagonal att -> one [BJ,BJ]@[BJ,Cp]
        # matmul, plus the diagonal identity (no [J,J] masks, no eye input).
        agg = jnp.dot(att, f_other.astype(jnp.bfloat16),
                      preferred_element_type=jnp.float32)
        out = agg + dg * (f_self - f_other)

        # BatchNorm1d (training mode): single-pass fused stats — one reduction
        # over the concatenated [out | out*out] slab instead of two passes.
        stats = jnp.sum(jnp.concatenate([out, out * out], axis=-1),
                        axis=0, keepdims=True)            # [1, 2*cp]
        mean = stats[:, :cp] * inv_n
        var = jnp.maximum(stats[:, cp:] * inv_n - mean * mean, 0.0)
        y = (out - mean) * jax.lax.rsqrt(var + BN_EPS)
        y = y * gamma_ref[l] + beta_ref[l]                # padded cols stay 0
        y = jnp.maximum(y, 0.0)                           # ReLU
        h = y.astype(jnp.bfloat16)

    out_ref[...] = y.astype(out_ref.dtype)


def _round_up(n, m):
    return ((n + m - 1) // m) * m


def _pack_params(params, c_in):
    """Stack per-layer params, lane-dense padded.

    Weights are stored transposed as [Cin, Cout].
      * Cout zero-padded up to a multiple of 128 (Cp) -> unmasked stores,
        full vreg lanes everywhere.
      * self|others concatenated on the output axis -> both 1x1 convs are one
        matmul with N = 2*Cp.
      * gamma/beta padded with ZEROS so padded channels stay exactly 0 through
        BN/ReLU (ones would leak rsqrt(eps)-scaled garbage).
    """
    cout = params[0][0].shape[1]
    cp = _round_up(cout, 128)                 # lane-dense padded Cout
    cin_pad = max(_round_up(c_in, 128), cp)   # first-layer K, also >= cp
    w_l, b_l, g_l, be_l = [], [], [], []
    for (ws, bs, wo, bo, gamma, beta) in params:
        cin_l = ws.shape[0]
        ws_p = jnp.zeros((cin_pad, cp), jnp.float32).at[:cin_l, :cout].set(ws)
        wo_p = jnp.zeros((cin_pad, cp), jnp.float32).at[:cin_l, :cout].set(wo)
        w_l.append(jnp.concatenate([ws_p, wo_p], axis=1))     # [cin_pad, 2*cp]
        bs_p = jnp.zeros((1, cp), jnp.float32).at[:, :cout].set(bs)
        bo_p = jnp.zeros((1, cp), jnp.float32).at[:, :cout].set(bo)
        b_l.append(jnp.concatenate([bs_p, bo_p], axis=1))     # [1, 2*cp]
        g_l.append(jnp.zeros((1, cp), jnp.float32).at[:, :cout].set(gamma))
        be_l.append(jnp.zeros((1, cp), jnp.float32).at[:, :cout].set(beta))
    w_s = jnp.stack(w_l).astype(jnp.bfloat16)  # MXU operands live in bf16
    return (w_s, jnp.stack(b_l), jnp.stack(g_l), jnp.stack(be_l),
            cin_pad, cp, cout)


def depth_gcn_forward(x, att, params, pool=None):
    """x: [B, J, C_in], att: [B, J, J] -> [B, J, C_out] (pool=None)."""
    B, J, c_in = x.shape
    BJ = B * J
    w_s, b_s, g_s, be_s, cin_pad, cp, cout = _pack_params(params, c_in)

    # Wrapper-side layout plumbing (free for the kernel): 2D activation slab
    # with zero-padded input channels, precomputed attention diagonal, and a
    # block-diagonal attention matrix so the kernel runs ONE full-width matmul
    # per layer.  Block-diag size is (B*J)^2; gate on VMEM budget if B grows.
    att = att.astype(jnp.float32)
    x2d = x.reshape(BJ, c_in).astype(jnp.float32)
    if c_in < cin_pad:
        x2d = jnp.pad(x2d, ((0, 0), (0, cin_pad - c_in)))
    diag = jnp.diagonal(att, axis1=1, axis2=2).reshape(BJ, 1)
    att_bd = (att[:, :, None, :]
              * jnp.eye(B, dtype=jnp.float32)[:, None, :, None]
              ).reshape(BJ, BJ).astype(jnp.bfloat16)

    L = int(w_s.shape[0])
    flops = int(L * (2 * BJ * cin_pad * (2 * cp)      # fused conv matmul
                     + 2 * BJ * BJ * cp               # attention matmul
                     + 12 * BJ * cp))                 # BN / ReLU elementwise
    bytes_accessed = int(4 * (x2d.size + diag.size + b_s.size + g_s.size
                              + be_s.size + BJ * cp)
                         + 2 * (att_bd.size + w_s.size))
    cost = pl.CostEstimate(flops=flops, transcendentals=int(L * cp),
                           bytes_accessed=bytes_accessed)

    vmem = pl.BlockSpec(memory_space=pltpu.MemorySpace.VMEM)
    out2d = pl.pallas_call(
        depth_gcn_fused_kernel,
        out_shape=jax.ShapeDtypeStruct((BJ, cp), jnp.float32),
        in_specs=[vmem] * 7,
        out_specs=vmem,
        cost_estimate=cost,
        # Whole problem is VMEM-resident at these shapes.
        # TODO(synk): for large B, grid over B with dimension_semantics=
        # ("parallel",) + a two-phase BN reduction, sized against v7x's 64 MiB
        # VMEM (>=512-row blocks, raise vmem_limit_bytes accordingly).
        compiler_params=pltpu.CompilerParams(vmem_limit_bytes=32 * 1024 * 1024),
    )(x2d, att_bd, diag, w_s, b_s, g_s, be_s)

    out = out2d[:, :cout].reshape(B, J, cout)

    if pool is None:
        return out
    elif pool == 'max':
        # torch.max(out, dim=1) returns (values, indices)
        return jnp.max(out, axis=1), jnp.argmax(out, axis=1)
    elif pool == 'avg':
        return jnp.mean(out, axis=1)
    else:
        raise NotImplementedError


def depth_gcn_reference(x, att, params):
    """Pure-JAX f32 reference mirroring the PyTorch module (training-mode BN)."""
    B, J, _ = x.shape
    eye = jnp.eye(J, dtype=jnp.float32)
    out = x.astype(jnp.float32)
    att = att.astype(jnp.float32)
    for (ws, bs, wo, bo, gamma, beta) in params:
        fs = jnp.einsum('bjc,cd->bjd', out, ws) + bs
        fo = jnp.einsum('bjc,cd->bjd', out, wo) + bo
        o = jnp.matmul(att * eye, fs) + jnp.matmul(att * (1.0 - eye), fo)
        mean = jnp.mean(o, axis=(0, 1), keepdims=True)
        var = jnp.mean(jnp.square(o - mean), axis=(0, 1), keepdims=True)
        o = (o - mean) * jax.lax.rsqrt(var + BN_EPS)
        o = o * gamma + beta
        out = jnp.maximum(o, 0.0)
    return out


def init_params(key, in_channels, out_channels, n_layers):
    """Deterministic synthetic init mimicking Conv1d / BatchNorm1d defaults."""
    params = []
    in_ch = in_channels
    for _ in range(n_layers):
        key, k1, k2, k3, k4 = jax.random.split(key, 5)
        bound = 1.0 / (in_ch ** 0.5)
        # Conv1d weight is [Cout, Cin, 1]; store transposed as [Cin, Cout].
        w_self = jax.random.uniform(k1, (out_channels, in_ch), jnp.float32,
                                    -bound, bound).T
        b_self = jax.random.uniform(k2, (1, out_channels), jnp.float32,
                                    -bound, bound)
        w_oth = jax.random.uniform(k3, (out_channels, in_ch), jnp.float32,
                                   -bound, bound).T
        b_oth = jax.random.uniform(k4, (1, out_channels), jnp.float32,
                                   -bound, bound)
        gamma = jnp.ones((1, out_channels), jnp.float32)   # BN weight init
        beta = jnp.zeros((1, out_channels), jnp.float32)   # BN bias init
        params.append((w_self, b_self, w_oth, b_oth, gamma, beta))
        in_ch = out_channels
    return params


if __name__ == "__main__":
    B, J, C_IN, C_OUT, N_LAYERS = 2, 16, 4, 32, 2

    key = jax.random.PRNGKey(0)
    kx, katt, kp = jax.random.split(key, 3)
    x = jax.random.normal(kx, (B, J, C_IN), jnp.float32)
    att = jax.nn.softmax(jax.random.normal(katt, (B, J, J), jnp.float32),
                         axis=-1)
    params = init_params(kp, C_IN, C_OUT, N_LAYERS)

    out = depth_gcn_forward(x, att, params, pool=None)
    out = jax.block_until_ready(out)
    assert out.shape == (B, J, C_OUT), out.shape
    assert bool(jnp.all(jnp.isfinite(out)))

    # Relaxed tolerance: MXU operands are bf16 (per perf review); accumulation
    # and BN statistics stay f32, so errors are small bf16-level deviations.
    ref = depth_gcn_reference(x, att, params)
    max_abs = float(jnp.max(jnp.abs(out - ref)))
    rel_fro = float(jnp.linalg.norm(out - ref)
                    / (jnp.linalg.norm(ref) + 1e-12))
    assert max_abs < 0.5 and rel_fro < 0.1, (max_abs, rel_fro)
    print("KERNEL_OK")
</pallas_src>

<mosaic_0001>
module attributes {stable_mosaic.version = 11 : i64} {
  func.func @depth_gcn_fused_kernel(%arg0: memref<32x128xf32, #tpu.memory_space<vmem>>, %arg1: memref<32x32xbf16, #tpu.memory_space<vmem>>, %arg2: memref<32x1xf32, #tpu.memory_space<vmem>>, %arg3: memref<2x128x256xbf16, #tpu.memory_space<vmem>>, %arg4: memref<2x1x256xf32, #tpu.memory_space<vmem>>, %arg5: memref<2x1x128xf32, #tpu.memory_space<vmem>>, %arg6: memref<2x1x128xf32, #tpu.memory_space<vmem>>, %arg7: memref<32x128xf32, #tpu.memory_space<vmem>>) attributes {dimension_semantics = [], scalar_prefetch = 0 : i64, scratch_operands = 0 : i64, tpu.core_type = #tpu.core_type<tc>} {
    %c0 = arith.constant 0 : index
    %c0_0 = arith.constant 0 : index
    %0 = vector.load %arg1[%c0, %c0_0] : memref<32x32xbf16, #tpu.memory_space<vmem>>, vector<32x32xbf16>
    %c0_1 = arith.constant 0 : index
    %c0_2 = arith.constant 0 : index
    %1 = vector.load %arg2[%c0_1, %c0_2] : memref<32x1xf32, #tpu.memory_space<vmem>>, vector<32x1xf32>
    %c0_3 = arith.constant 0 : index
    %c0_4 = arith.constant 0 : index
    %2 = vector.load %arg0[%c0_3, %c0_4] : memref<32x128xf32, #tpu.memory_space<vmem>>, vector<32x128xf32>
    %3 = arith.truncf %2 : vector<32x128xf32> to vector<32x128xbf16>
    %c0_5 = arith.constant 0 : index
    %c0_6 = arith.constant 0 : index
    %c0_7 = arith.constant 0 : index
    %4 = vector.load %arg3[%c0_5, %c0_6, %c0_7] : memref<2x128x256xbf16, #tpu.memory_space<vmem>>, vector<1x128x256xbf16>
    %5 = vector.shape_cast %4 : vector<1x128x256xbf16> to vector<128x256xbf16>
    %cst = arith.constant dense<0.000000e+00> : vector<32x256xf32>
    %6 = tpu.matmul %3, %5, %cst {dimension_numbers = #tpu.dot_dimension_numbers<[1], [0], [0], [1], [0, 0, 1, 1], [], []>} : vector<32x128xbf16>, vector<128x256xbf16>, vector<32x256xf32> -> vector<32x256xf32>
    %c0_8 = arith.constant 0 : index
    %c0_9 = arith.constant 0 : index
    %c0_10 = arith.constant 0 : index
    %7 = vector.load %arg4[%c0_8, %c0_9, %c0_10] : memref<2x1x256xf32, #tpu.memory_space<vmem>>, vector<1x1x256xf32>
    %8 = vector.shape_cast %7 : vector<1x1x256xf32> to vector<1x256xf32>
    %9 = vector.broadcast %8 : vector<1x256xf32> to vector<32x256xf32>
    %10 = arith.addf %6, %9 : vector<32x256xf32>
    %11 = vector.extract_strided_slice %10 {offsets = [0, 0], sizes = [32, 128], strides = [1, 1]} : vector<32x256xf32> to vector<32x128xf32>
    %12 = vector.extract_strided_slice %10 {offsets = [0, 128], sizes = [32, 128], strides = [1, 1]} : vector<32x256xf32> to vector<32x128xf32>
    %13 = arith.truncf %12 : vector<32x128xf32> to vector<32x128xbf16>
    %cst_11 = arith.constant dense<0.000000e+00> : vector<32x128xf32>
    %14 = tpu.matmul %0, %13, %cst_11 {dimension_numbers = #tpu.dot_dimension_numbers<[1], [0], [0], [1], [0, 0, 1, 1], [], []>} : vector<32x32xbf16>, vector<32x128xbf16>, vector<32x128xf32> -> vector<32x128xf32>
    %15 = arith.subf %11, %12 : vector<32x128xf32>
    %16 = vector.broadcast %1 : vector<32x1xf32> to vector<32x128xf32>
    %17 = arith.mulf %16, %15 : vector<32x128xf32>
    %18 = arith.addf %14, %17 : vector<32x128xf32>
    %19 = arith.mulf %18, %18 : vector<32x128xf32>
    %20 = tpu.concatenate %18, %19 in 1 : vector<32x128xf32>, vector<32x128xf32> -> vector<32x256xf32>
    %cst_12 = arith.constant dense<0.000000e+00> : vector<256xf32>
    %21 = vector.multi_reduction <add>, %20, %cst_12 [0] : vector<32x256xf32> to vector<256xf32>
    %22 = vector.shape_cast %21 : vector<256xf32> to vector<1x256xf32>
    %23 = vector.extract_strided_slice %22 {offsets = [0, 0], sizes = [1, 128], strides = [1, 1]} : vector<1x256xf32> to vector<1x128xf32>
    %cst_13 = arith.constant 3.125000e-02 : f32
    %24 = vector.broadcast %cst_13 : f32 to vector<1x128xf32>
    %25 = arith.mulf %23, %24 : vector<1x128xf32>
    %26 = vector.extract_strided_slice %22 {offsets = [0, 128], sizes = [1, 128], strides = [1, 1]} : vector<1x256xf32> to vector<1x128xf32>
    %cst_14 = arith.constant 3.125000e-02 : f32
    %27 = vector.broadcast %cst_14 : f32 to vector<1x128xf32>
    %28 = arith.mulf %26, %27 : vector<1x128xf32>
    %29 = arith.mulf %25, %25 : vector<1x128xf32>
    %30 = arith.subf %28, %29 : vector<1x128xf32>
    %cst_15 = arith.constant 0.000000e+00 : f32
    %31 = vector.broadcast %cst_15 : f32 to vector<1x128xf32>
    %32 = arith.maximumf %30, %31 : vector<1x128xf32>
    %33 = vector.broadcast %25 : vector<1x128xf32> to vector<32x128xf32>
    %34 = arith.subf %18, %33 : vector<32x128xf32>
    %cst_16 = arith.constant 9.99999974E-6 : f32
    %35 = vector.broadcast %cst_16 : f32 to vector<1x128xf32>
    %36 = arith.addf %32, %35 : vector<1x128xf32>
    %37 = math.rsqrt %36 : vector<1x128xf32>
    %38 = vector.broadcast %37 : vector<1x128xf32> to vector<32x128xf32>
    %39 = arith.mulf %34, %38 : vector<32x128xf32>
    %c0_17 = arith.constant 0 : index
    %c0_18 = arith.constant 0 : index
    %c0_19 = arith.constant 0 : index
    %40 = vector.load %arg5[%c0_17, %c0_18, %c0_19] : memref<2x1x128xf32, #tpu.memory_space<vmem>>, vector<1x1x128xf32>
    %41 = vector.shape_cast %40 : vector<1x1x128xf32> to vector<1x128xf32>
    %42 = vector.broadcast %41 : vector<1x128xf32> to vector<32x128xf32>
    %43 = arith.mulf %39, %42 : vector<32x128xf32>
    %c0_20 = arith.constant 0 : index
    %c0_21 = arith.constant 0 : index
    %c0_22 = arith.constant 0 : index
    %44 = vector.load %arg6[%c0_20, %c0_21, %c0_22] : memref<2x1x128xf32, #tpu.memory_space<vmem>>, vector<1x1x128xf32>
    %45 = vector.shape_cast %44 : vector<1x1x128xf32> to vector<1x128xf32>
    %46 = vector.broadcast %45 : vector<1x128xf32> to vector<32x128xf32>
    %47 = arith.addf %43, %46 : vector<32x128xf32>
    %cst_23 = arith.constant 0.000000e+00 : f32
    %48 = vector.broadcast %cst_23 : f32 to vector<32x128xf32>
    %49 = arith.maximumf %47, %48 : vector<32x128xf32>
    %50 = arith.truncf %49 : vector<32x128xf32> to vector<32x128xbf16>
    %c1 = arith.constant 1 : index
    %c0_24 = arith.constant 0 : index
    %c0_25 = arith.constant 0 : index
    %51 = vector.load %arg3[%c1, %c0_24, %c0_25] : memref<2x128x256xbf16, #tpu.memory_space<vmem>>, vector<1x128x256xbf16>
    %52 = vector.shape_cast %51 : vector<1x128x256xbf16> to vector<128x256xbf16>
    %cst_26 = arith.constant dense<0.000000e+00> : vector<32x256xf32>
    %53 = tpu.matmul %50, %52, %cst_26 {dimension_numbers = #tpu.dot_dimension_numbers<[1], [0], [0], [1], [0, 0, 1, 1], [], []>} : vector<32x128xbf16>, vector<128x256xbf16>, vector<32x256xf32> -> vector<32x256xf32>
    %c1_27 = arith.constant 1 : index
    %c0_28 = arith.constant 0 : index
    %c0_29 = arith.constant 0 : index
    %54 = vector.load %arg4[%c1_27, %c0_28, %c0_29] : memref<2x1x256xf32, #tpu.memory_space<vmem>>, vector<1x1x256xf32>
    %55 = vector.shape_cast %54 : vector<1x1x256xf32> to vector<1x256xf32>
    %56 = vector.broadcast %55 : vector<1x256xf32> to vector<32x256xf32>
    %57 = arith.addf %53, %56 : vector<32x256xf32>
    %58 = vector.extract_strided_slice %57 {offsets = [0, 0], sizes = [32, 128], strides = [1, 1]} : vector<32x256xf32> to vector<32x128xf32>
    %59 = vector.extract_strided_slice %57 {offsets = [0, 128], sizes = [32, 128], strides = [1, 1]} : vector<32x256xf32> to vector<32x128xf32>
    %60 = arith.truncf %59 : vector<32x128xf32> to vector<32x128xbf16>
    %cst_30 = arith.constant dense<0.000000e+00> : vector<32x128xf32>
    %61 = tpu.matmul %0, %60, %cst_30 {dimension_numbers = #tpu.dot_dimension_numbers<[1], [0], [0], [1], [0, 0, 1, 1], [], []>} : vector<32x32xbf16>, vector<32x128xbf16>, vector<32x128xf32> -> vector<32x128xf32>
    %62 = arith.subf %58, %59 : vector<32x128xf32>
    %63 = vector.broadcast %1 : vector<32x1xf32> to vector<32x128xf32>
    %64 = arith.mulf %63, %62 : vector<32x128xf32>
    %65 = arith.addf %61, %64 : vector<32x128xf32>
    %66 = arith.mulf %65, %65 : vector<32x128xf32>
    %67 = tpu.concatenate %65, %66 in 1 : vector<32x128xf32>, vector<32x128xf32> -> vector<32x256xf32>
    %cst_31 = arith.constant dense<0.000000e+00> : vector<256xf32>
    %68 = vector.multi_reduction <add>, %67, %cst_31 [0] : vector<32x256xf32> to vector<256xf32>
    %69 = vector.shape_cast %68 : vector<256xf32> to vector<1x256xf32>
    %70 = vector.extract_strided_slice %69 {offsets = [0, 0], sizes = [1, 128], strides = [1, 1]} : vector<1x256xf32> to vector<1x128xf32>
    %cst_32 = arith.constant 3.125000e-02 : f32
    %71 = vector.broadcast %cst_32 : f32 to vector<1x128xf32>
    %72 = arith.mulf %70, %71 : vector<1x128xf32>
    %73 = vector.extract_strided_slice %69 {offsets = [0, 128], sizes = [1, 128], strides = [1, 1]} : vector<1x256xf32> to vector<1x128xf32>
    %cst_33 = arith.constant 3.125000e-02 : f32
    %74 = vector.broadcast %cst_33 : f32 to vector<1x128xf32>
    %75 = arith.mulf %73, %74 : vector<1x128xf32>
    %76 = arith.mulf %72, %72 : vector<1x128xf32>
    %77 = arith.subf %75, %76 : vector<1x128xf32>
    %cst_34 = arith.constant 0.000000e+00 : f32
    %78 = vector.broadcast %cst_34 : f32 to vector<1x128xf32>
    %79 = arith.maximumf %77, %78 : vector<1x128xf32>
    %80 = vector.broadcast %72 : vector<1x128xf32> to vector<32x128xf32>
    %81 = arith.subf %65, %80 : vector<32x128xf32>
    %cst_35 = arith.constant 9.99999974E-6 : f32
    %82 = vector.broadcast %cst_35 : f32 to vector<1x128xf32>
    %83 = arith.addf %79, %82 : vector<1x128xf32>
    %84 = math.rsqrt %83 : vector<1x128xf32>
    %85 = vector.broadcast %84 : vector<1x128xf32> to vector<32x128xf32>
    %86 = arith.mulf %81, %85 : vector<32x128xf32>
    %c1_36 = arith.constant 1 : index
    %c0_37 = arith.constant 0 : index
    %c0_38 = arith.constant 0 : index
    %87 = vector.load %arg5[%c1_36, %c0_37, %c0_38] : memref<2x1x128xf32, #tpu.memory_space<vmem>>, vector<1x1x128xf32>
    %88 = vector.shape_cast %87 : vector<1x1x128xf32> to vector<1x128xf32>
    %89 = vector.broadcast %88 : vector<1x128xf32> to vector<32x128xf32>
    %90 = arith.mulf %86, %89 : vector<32x128xf32>
    %c1_39 = arith.constant 1 : index
    %c0_40 = arith.constant 0 : index
    %c0_41 = arith.constant 0 : index
    %91 = vector.load %arg6[%c1_39, %c0_40, %c0_41] : memref<2x1x128xf32, #tpu.memory_space<vmem>>, vector<1x1x128xf32>
    %92 = vector.shape_cast %91 : vector<1x1x128xf32> to vector<1x128xf32>
    %93 = vector.broadcast %92 : vector<1x128xf32> to vector<32x128xf32>
    %94 = arith.addf %90, %93 : vector<32x128xf32>
    %cst_42 = arith.constant 0.000000e+00 : f32
    %95 = vector.broadcast %cst_42 : f32 to vector<32x128xf32>
    %96 = arith.maximumf %94, %95 : vector<32x128xf32>
    %c0_43 = arith.constant 0 : index
    %c0_44 = arith.constant 0 : index
    %97 = vector.load %arg7[%c0_43, %c0_44] : memref<32x128xf32, #tpu.memory_space<vmem>>, vector<32x128xf32>
    tpu.vector_store %arg7[%c0_43, %c0_44], %96 {strides = array<i32>} : memref<32x128xf32, #tpu.memory_space<vmem>>, vector<32x128xf32>,
    return
  }
}

</mosaic_0001>

<bundles_post_ra>
// kernel: tpu_custom_call.1
= control target key start
LH: loop header
LB: loop body
LE: loop exit
PB: predicated region body
PF: predicated region fallthrough
CT: control target
= control target key end

     0   :  { %12 = vsyncpa [#allocation3], 0  ;;  %s1094_s0 = inlined_call_operand.vmem [shape: f32[32,128], index: 0, kind: input, shape index: {}]   ;;  %s1095_s1 = inlined_call_operand.hbm [shape: bf16[32,32], index: 1, kind: input, shape index: {}]   ;;  %s1096_s2 = inlined_call_operand.vmem [shape: f32[32,1], index: 2, kind: input, shape index: {}]   ;;  %s1097_s3 = inlined_call_operand.hbm [shape: bf16[2,128,256], index: 3, kind: input, shape index: {}]   ;;  %s1098_s4 = inlined_call_operand.vmem [shape: f32[2,1,256], index: 4, kind: input, shape index: {}]   ;;  %s1099_s5 = inlined_call_operand.vmem [shape: f32[2,1,128], index: 5, kind: input, shape index: {}]   ;;  %s1100_s6 = inlined_call_operand.vmem [shape: f32[2,1,128], index: 6, kind: input, shape index: {}]   ;;  %s1101_s7 = inlined_call_operand.hbm [shape: f32[32,128], index: 7, kind: output, shape index: {}]  }
   0x1   :  { %13 = vsyncpa [#allocation6], 0 }
   0x2   :  { %14 = vsyncpa [#allocation4], 0  ;;  %s906_s24 = smov [#allocation2]   ;;  %s834_s28 = scalar_lea.hbm %s1095_s1, 256 }
   0x3   :  { %s22_s25 = sshll.u32 %s906_s24, 4  ;;  %p835_p0 = scmp.ne.s32.totalorder %s1095_s1, %s834_s28  ;;  %s23_s25 = int_to_ptr.vmem [resolvable:$true] %s22_s25 }
   0x4   :  { %p838_p1 = scmp.lt.u32.totalorder %s834_s28, %s1095_s1 }
   0x6   :  { %p840_p2 = pnand %p838_p1, %p835_p0 }
   0x8   :  { %843 = shalt.err (!%p840_p2)
}
   0x9   :  { %s844_s10 = scalar_lea.vmem %s23_s25, 256  ;;  %p849_p4 = scmp.lt.s32.totalorder %s23_s25, %s23_s25 }
   0xa   :  { %p845_p3 = scmp.ne.s32.totalorder %s23_s25, %s844_s10  ;;  %p850_p5 = scmp.lt.s32.totalorder %s844_s10, %s844_s10 }
   0xc   :  { %p851_p6 = por %p850_p5, %p849_p4 }
   0xe   :  { %p852_p7 = pnand %p851_p6, %p845_p3 }
  0x10   :  { %855 = shalt.err (!%p852_p7)
}
  0x11   :  { %s907_s11 = smov 64   ;;  %s908_s12 = smov 4  }
  0x12   :  { %28 = dma.hbm_to_vmem [thread:$0]  %s1095_s1, 256, %s23_s25, [#allocation3], %s907_s11, %s907_s11, %s908_s12  }
  0x13   :  { %s909_s15 = smov [#allocation5]   ;;  %s856_s19 = scalar_lea.hbm %s1097_s3, 4096 }
  0x14   :  { %s36_s16 = sshll.u32 %s909_s15, 4  ;;  %p857_p8 = scmp.ne.s32.totalorder %s1097_s3, %s856_s19  ;;  %s37_s16 = int_to_ptr.vmem [resolvable:$true] %s36_s16 }
  0x15   :  { %p860_p9 = scmp.lt.u32.totalorder %s856_s19, %s1097_s3 }
  0x17   :  { %p862_p10 = pnand %p860_p9, %p857_p8 }
  0x19   :  { %865 = shalt.err (!%p862_p10)
}
  0x1a   :  { %s866_s24 = scalar_lea.vmem %s37_s16, 4096  ;;  %p871_p12 = scmp.lt.s32.totalorder %s37_s16, %s37_s16 }
  0x1b   :  { %p867_p11 = scmp.ne.s32.totalorder %s37_s16, %s866_s24  ;;  %p872_p13 = scmp.lt.s32.totalorder %s866_s24, %s866_s24 }
  0x1d   :  { %p873_p0 = por %p872_p13, %p871_p12 }
  0x1f   :  { %p874_p1 = pnand %p873_p0, %p867_p11 }
  0x21   :  { %877 = shalt.err (!%p874_p1)
}
  0x22   :  { %s910_s1 = smov 128   ;;  %s911_s25 = smov 8  }
  0x23   :  { %42 = dma.hbm_to_vmem [thread:$0]  %s1097_s3, 4096, %s37_s16, [#allocation6], %s910_s1, %s910_s1, %s911_s25  }
  0x24   :  { %900 = dma.done.wait [#allocation3], 256  }
  0x25   :  { %901 = vsyncadd [#allocation3], 4294967040 }
  0x26   :  { %902 = dma.done.wait [#allocation6], 4096  }
  0x27   :  { %903 = vsyncadd [#allocation6], 4294963200  ;;  %v912_v0 = vmov 0   ;;  %v780_v1 = vld [vmem:[#allocation5 + $0x4] ss:$8 sps:$4 sm:$0xff]   ;;  %v60_v10 = vld [vmem:[%s1096_s2] sm:$0xff]  ;;  %v88_v28 = vlaneseq }
  0x28   :  { %210 = vmatprep.mubr.bf16.mxu0 %v912_v0  ;;  %778 = vset.pattern.permute.xlu0 %v912_v0  ;;  %v782_v2 = vld [vmem:[#allocation5] ss:$8 sps:$4 sm:$0xff]   ;;  %v783_v3 = vld [vmem:[#allocation5 + $0x14] ss:$8 sps:$4 sm:$0xff]   ;;  %v785_v4 = vld [vmem:[#allocation5 + $0x10] ss:$8 sps:$4 sm:$0xff]  }
  0x29   :  { %779 = vset.pattern.permute.xlu1 %v912_v0  ;;  %178 = vmatprep.subr.bf16.mxu0 %v780_v1  ;;  %v786_v5 = vld [vmem:[#allocation5 + $0x24] ss:$8 sps:$4 sm:$0xff]   ;;  %v788_v6 = vld [vmem:[#allocation5 + $0x20] ss:$8 sps:$4 sm:$0xff]   ;;  %v789_v7 = vld [vmem:[#allocation5 + $0x34] ss:$8 sps:$4 sm:$0xff]  }
  0x2a   :  { %179 = vmatpush1.bf16.msra.mxu0 %v782_v2  ;;  %v791_v8 = vld [vmem:[#allocation5 + $0x30] ss:$8 sps:$4 sm:$0xff]   ;;  %v792_v9 = vld [vmem:[#allocation5 + $0x44] ss:$8 sps:$4 sm:$0xff]   ;;  %v794_v12 = vld [vmem:[#allocation5 + $0x40] ss:$8 sps:$4 sm:$0xff]   ;;  %239 = vperm.xlu0 %778, %v60_v10  }
  0x2b   :  { %180 = vmatprep.subr.bf16.mxu0 %v783_v3  ;;  %v62_v11 = vld [vmem:[%s1096_s2 + $0x10] sm:$0xff]  ;;  %v61_v13 = vld [vmem:[%s1096_s2 + $0x8] sm:$0xff]  ;;  %v63_v14 = vld [vmem:[%s1096_s2 + $0x18] sm:$0xff]  ;;  %vm271_vm0 = vcmask 261120   ;;  %v1011_v29 = vshrl.u32 %v88_v28, 7  ;;  %s913_s29 = smov [#allocation7]  }
  0x2c   :  { %249 = vperm.xlu1 %779, %v62_v11   ;;  %v795_v15 = vld [vmem:[#allocation5 + $0x54] ss:$8 sps:$4 sm:$0xff]   ;;  %v797_v16 = vld [vmem:[#allocation5 + $0x50] ss:$8 sps:$4 sm:$0xff]   ;;  %v798_v17 = vld [vmem:[#allocation5 + $0x64] ss:$8 sps:$4 sm:$0xff]  }
  0x2d   :  { %v800_v18 = vld [vmem:[#allocation5 + $0x60] ss:$8 sps:$4 sm:$0xff]   ;;  %v801_v19 = vld [vmem:[#allocation5 + $0x74] ss:$8 sps:$4 sm:$0xff]   ;;  %v803_v20 = vld [vmem:[#allocation5 + $0x70] ss:$8 sps:$4 sm:$0xff]  }
  0x2e   :  { %181 = vmatpush1.bf16.msra.mxu0 %v785_v4  ;;  %244 = vperm.xlu0 %778, %v61_v13   ;;  %v64_v21 = vld [vmem:[%s1094_s0] sm:$0xff]  ;;  %v65_v22 = vld [vmem:[%s1094_s0 + $0x8] sm:$0xff]  ;;  %v66_v24 = vld [vmem:[%s1094_s0 + $0x10] sm:$0xff]  ;;  %v90_v30 = vsub.s32 0, %v1011_v29  ;;  %v94_v32 = vsub.s32 1, %v1011_v29  ;;  %s688_s30 = sshll.u32 %s913_s29, 4  ;;  %s689_s30 = int_to_ptr.vmem [resolvable:$true] %s688_s30 }
  0x2f   :  { %182 = vmatprep.subr.bf16.mxu0 %v786_v5  ;;  %v68_v23 = vpack.c.bf16 %v65_v22, %v64_v21  ;;  %v67_v25 = vld [vmem:[%s1094_s0 + $0x18] sm:$0xff]  ;;  %v804_v27 = vld [vmem:[#allocation2] sm:$0xff]   ;;  %v1036_v57 = vld [vmem:[#allocation2 + $0x8] sm:$0xff]   ;;  %p883_p3 = scmp.lt.s32.totalorder %s689_s30, %s689_s30 }
  0x30   :  { %254 = vperm.xlu1 %779, %v63_v14   ;;  %v69_v26 = vpack.c.bf16 %v67_v25, %v66_v24  ;;  %758 = vmatprep.mubr.msk.bf16.mxu1 %vm271_vm0, %v804_v27  ;;  %v86_v31 = vld [vmem:[%s1098_s4] sm:$0x3]  ;;  %v808_v58 = vld [vmem:[#allocation5 + $0x84] ss:$8 sps:$4 sm:$0xff]   ;;  %v806_v59 = vld [vmem:[#allocation5 + $0x80] ss:$8 sps:$4 sm:$0xff]  }
  0x31   :  { %v91_v33 = vrot.slane %v86_v31, %v90_v30  ;;  %v95_v34 = vrot.slane %v86_v31, %v94_v32  ;;  %v811_v60 = vld [vmem:[#allocation5 + $0x94] ss:$8 sps:$4 sm:$0xff]   ;;  %v809_v61 = vld [vmem:[#allocation5 + $0x90] ss:$8 sps:$4 sm:$0xff]   ;;  %v814_v62 = vld [vmem:[#allocation5 + $0xa4] ss:$8 sps:$4 sm:$0xff]  }
  0x32   :  { %183 = vmatpush1.bf16.msra.mxu0 %v788_v6  ;;  %v812_v63 = vld [vmem:[#allocation5 + $0xa0] ss:$8 sps:$4 sm:$0xff]   ;;  %v817_v1 = vld [vmem:[#allocation5 + $0xb4] ss:$8 sps:$4 sm:$0xff]   ;;  %v815_v2 = vld [vmem:[#allocation5 + $0xb0] ss:$8 sps:$4 sm:$0xff]  }
  0x33   :  { %184 = vmatprep.subr.bf16.mxu0 %v789_v7  ;;  %v820_v3 = vld [vmem:[#allocation5 + $0xc4] ss:$8 sps:$4 sm:$0xff]   ;;  %v818_v4 = vld [vmem:[#allocation5 + $0xc0] ss:$8 sps:$4 sm:$0xff]   ;;  %v823_v5 = vld [vmem:[#allocation5 + $0xd4] ss:$8 sps:$4 sm:$0xff]  }
  0x34   :  { %v821_v6 = vld [vmem:[#allocation5 + $0xd0] ss:$8 sps:$4 sm:$0xff]   ;;  %v826_v7 = vld [vmem:[#allocation5 + $0xe4] ss:$8 sps:$4 sm:$0xff]  }
  0x35   :  { %v827_v10 = vld [vmem:[#allocation5 + $0xf0] ss:$8 sps:$4 sm:$0xff]  }
  0x36   :  { %185 = vmatpush1.bf16.msra.mxu0 %v791_v8  ;;  %v824_v8 = vld [vmem:[#allocation5 + $0xe0] ss:$8 sps:$4 sm:$0xff]  }
  0x37   :  { %186 = vmatprep.subr.bf16.mxu0 %v792_v9  ;;  %v829_v9 = vld [vmem:[#allocation5 + $0xf4] ss:$8 sps:$4 sm:$0xff]  }
  0x3a   :  { %187 = vmatpush1.bf16.msra.mxu0 %v794_v12 }
  0x3b   :  { %188 = vmatprep.subr.bf16.mxu0 %v795_v15 }
  0x3e   :  { %189 = vmatpush1.bf16.msra.mxu0 %v797_v16 }
  0x3f   :  { %190 = vmatprep.subr.bf16.mxu0 %v798_v17 }
  0x42   :  { %191 = vmatpush1.bf16.msra.mxu0 %v800_v18 }
  0x43   :  { %192 = vmatprep.subr.bf16.mxu0 %v801_v19 }
  0x46   :  { %193 = vmatpush1.bf16.msra.mxu0 %v803_v20 }
  0x49   :  { %211 = vmatmul.mubr.bf16.vlgmr.msra.gmra.mrb[0].mxu0 %v68_v23 }
  0x4a   :  { %220 = vmatprep.mubr.bf16.mxu0 %v912_v0 }
  0x51   :  { %221 = vmatmul.mubr.bf16.gmra.mrb[4].mxu0 %v69_v26 }
  0x52   :  { %766 = vmatprep.mubr.msk.bf16.mxu0 %vm271_vm0, %v804_v27 }
  0xa9   :  { %v1043_v12 = vpop.permute.xlu0 %239 }
  0xab   :  { %v1041_v11 = vpop.permute.xlu1 %249 }
  0xad   :  { %v1047_v14 = vpop.permute.xlu0 %244 }
  0xaf   :  { %v1045_v13 = vpop.permute.xlu1 %254 }
 0x11c   :  { %v212_v35 = vpop.f32.mrb[0].mxu0 }
 0x11d   :  { %v1022_v36 = vadd.f32 %v212_v35, %v91_v33  ;;  %v214_v37 = vpop.f32.mrb[1].mxu0 }
 0x11e   :  { %v1024_v38 = vadd.f32 %v214_v37, %v95_v34  ;;  %v216_v39 = vpop.f32.mrb[2].mxu0 }
 0x11f   :  { %v1026_v40 = vadd.f32 %v216_v39, %v91_v33  ;;  %v218_v41 = vpop.f32.mrb[3].mxu0 }
 0x120   :  { %v233_v42 = vsub.f32 %v1022_v36, %v1024_v38  ;;  %v1030_v43 = vadd.f32 %v218_v41, %v95_v34 }
 0x122   :  { %v234_v44 = vsub.f32 %v1026_v40, %v1030_v43  ;;  %v231_v45 = vpack.c.bf16 %v1030_v43, %v1024_v38  ;;  %v257_v16 = vmul.f32 %v1043_v12, %v233_v42 }
 0x124   :  { %v222_v46 = vpop.f32.mrb[4].mxu0  ;;  %754 = vmatprep.subr.bf16.mxu1 %v231_v45  ;;  %v258_v21 = vmul.f32 %v1047_v14, %v234_v44 }
 0x125   :  { %v223_v47 = vadd.f32 %v222_v46, %v91_v33  ;;  %v224_v48 = vpop.f32.mrb[5].mxu0  ;;  %755 = vmatpush3.bf16.msra.mxu1 %v231_v45 }
 0x126   :  { %v225_v49 = vadd.f32 %v224_v48, %v95_v34  ;;  %v226_v50 = vpop.f32.mrb[6].mxu0 }
 0x127   :  { %v227_v51 = vadd.f32 %v226_v50, %v91_v33  ;;  %v228_v52 = vpop.f32.mrb[7].mxu0 }
 0x128   :  { %v235_v53 = vsub.f32 %v223_v47, %v225_v49  ;;  %v229_v54 = vadd.f32 %v228_v52, %v95_v34 }
 0x12a   :  { %v232_v55 = vpack.c.bf16 %v229_v54, %v225_v49  ;;  %v236_v56 = vsub.f32 %v227_v51, %v229_v54  ;;  %v259_v15 = vmul.f32 %v1041_v11, %v235_v53 }
 0x12c   :  { %756 = vmatprep.subr.bf16.mxu1 %v232_v55  ;;  %v260_v18 = vmul.f32 %v1045_v13, %v236_v56 }
 0x12d   :  { %757 = vmatpush3.bf16.msra.mxu1 %v232_v55 }
 0x12e   :  { %502 = vmatprep.subr.bf16.mxu1 %v808_v58 }
 0x130   :  { %759 = vmatmul.mubr.msk.bf16.vlgmr.msra.gmra.mrb[0].mxu1 %vm271_vm0, %v1036_v57 }
 0x131   :  { %534 = vmatprep.mubr.bf16.mxu1 %v912_v0  ;;  %503 = vmatpush1.bf16.msra.mxu1 %v806_v59 }
 0x132   :  { %504 = vmatprep.subr.bf16.mxu1 %v811_v60 }
 0x135   :  { %505 = vmatpush1.bf16.msra.mxu1 %v809_v61 }
 0x136   :  { %506 = vmatprep.subr.bf16.mxu1 %v814_v62 }
 0x139   :  { %507 = vmatpush1.bf16.msra.mxu1 %v812_v63 }
 0x13a   :  { %508 = vmatprep.subr.bf16.mxu1 %v817_v1  ;;  %v721_v1 = vld [vmem:[%s1099_s5] ss:$0 sm:$0xff] }
 0x13d   :  { %509 = vmatpush1.bf16.msra.mxu1 %v815_v2 }
 0x13e   :  { %510 = vmatprep.subr.bf16.mxu1 %v820_v3 }
 0x141   :  { %511 = vmatpush1.bf16.msra.mxu1 %v818_v4 }
 0x142   :  { %512 = vmatprep.subr.bf16.mxu1 %v823_v5 }
 0x145   :  { %513 = vmatpush1.bf16.msra.mxu1 %v821_v6  ;;  %v722_v6 = vld [vmem:[%s1100_s6] ss:$0 sm:$0xff] }
 0x146   :  { %514 = vmatprep.subr.bf16.mxu1 %v826_v7 }
 0x149   :  { %515 = vmatpush1.bf16.msra.mxu1 %v824_v8 }
 0x14a   :  { %516 = vmatprep.subr.bf16.mxu1 %v829_v9 }
 0x14d   :  { %517 = vmatpush1.bf16.msra.mxu1 %v827_v10 }
 0x203   :  { %v760_v17 = vpop.f32.mrb[0].mxu1 }
 0x204   :  { %v321_v19 = vadd.f32 %v760_v17, %v259_v15  ;;  %v312_v20 = vpop.f32.mrb[1].mxu1 }
 0x205   :  { %v313_v22 = vadd.f32 %v312_v20, %v257_v16  ;;  %v761_v23 = vpop.f32.mrb[2].mxu1 }
 0x206   :  { %v324_v24 = vadd.f32 %v761_v23, %v260_v18  ;;  %v315_v25 = vpop.f32.mrb[3].mxu1  ;;  %v329_v33 = vmul.f32 %v321_v19, %v321_v19 }
 0x207   :  { %v316_v26 = vadd.f32 %v315_v25, %v258_v21  ;;  %v327_v27 = vmul.f32 %v313_v22, %v313_v22  ;;  %v723_v25 = vld [vmem:[%s1098_s4 + $0x2] sm:$0x3] }
 0x208   :  { %v330_v36 = vmul.f32 %v324_v24, %v324_v24 }
 0x209   :  { %v328_v28 = vmul.f32 %v316_v26, %v316_v26  ;;  %v331_v31 = vadd.f32 %v316_v26, %v313_v22 }
 0x20b   :  { %v332_v34 = vadd.f32 %v331_v31, %v321_v19  ;;  %v340_v35 = vadd.f32 %v328_v28, %v327_v27  ;;  %v419_v27 = vrot.slane %v723_v25, %v94_v32 }
 0x20d   :  { %v333_v37 = vadd.f32 %v332_v34, %v324_v24  ;;  %v341_v38 = vadd.f32 %v340_v35, %v329_v33 }
 0x20f   :  { %v334_v39 = vrot.slane %v333_v37, 4  ;;  %v342_v40 = vadd.f32 %v341_v38, %v330_v36 }
 0x211   :  { %v335_v41 = vadd.f32 %v334_v39, %v333_v37  ;;  %v343_v42 = vrot.slane %v342_v40, 4 }
 0x213   :  { %v336_v43 = vrot.slane %v335_v41, 2  ;;  %v344_v44 = vadd.f32 %v343_v42, %v342_v40 }
 0x215   :  { %v337_v45 = vadd.f32 %v336_v43, %v335_v41  ;;  %v345_v46 = vrot.slane %v344_v44, 2 }
 0x217   :  { %v338_v47 = vrot.slane %v337_v45, 1  ;;  %v346_v48 = vadd.f32 %v345_v46, %v344_v44 }
 0x219   :  { %v339_v49 = vadd.f32 %v338_v47, %v337_v45  ;;  %v347_v50 = vrot.slane %v346_v48, 1 }
 0x21b   :  { %v348_v51 = vadd.f32 %v347_v50, %v346_v48  ;;  %v349_v52 = vmul.f32 0.03125, %v339_v49 }
 0x21d   :  { %v350_v53 = vmul.f32 0.03125, %v348_v51  ;;  %v351_v54 = vmul.f32 %v349_v52, %v349_v52  ;;  %v355_v55 = vsub.f32 %v316_v26, %v349_v52  ;;  %v354_v56 = vsub.f32 %v313_v22, %v349_v52 }
 0x21e   :  { %v356_v58 = vsub.f32 %v321_v19, %v349_v52  ;;  %v357_v59 = vsub.f32 %v324_v24, %v349_v52  ;;  %v415_v26 = vrot.slane %v723_v25, %v90_v30 }
 0x21f   :  { %v352_v60 = vsub.f32 %v350_v53, %v351_v54 }
 0x221   :  { %v353_v61 = vmax.f32 %v352_v60, 0.0 }
 0x223   :  { %v358_v62 = vadd.f32 1e-05, %v353_v61 }
 0x225   :  { %830 = vrsqrt.f32 %v358_v62 }
 0x22f   :  { %v831_v63 = vpop.eup %830 }
 0x230   :  { %v361_v2 = vmul.f32 %v831_v63, %v355_v55  ;;  %v360_v3 = vmul.f32 %v831_v63, %v354_v56  ;;  %v362_v4 = vmul.f32 %v831_v63, %v356_v58  ;;  %v363_v5 = vmul.f32 %v831_v63, %v357_v59 }
 0x232   :  { %v372_v7 = vmul.f32 %v721_v1, %v361_v2  ;;  %v371_v8 = vmul.f32 %v721_v1, %v360_v3  ;;  %v373_v9 = vmul.f32 %v721_v1, %v362_v4  ;;  %v374_v10 = vmul.f32 %v721_v1, %v363_v5 }
 0x234   :  { %v382_v15 = vadd.f32 %v722_v6, %v371_v8  ;;  %v383_v16 = vadd.f32 %v722_v6, %v372_v7  ;;  %v384_v17 = vadd.f32 %v722_v6, %v373_v9  ;;  %v385_v18 = vadd.f32 %v722_v6, %v374_v10 }
 0x236   :  { %v386_v19 = vmax.f32 %v382_v15, 0.0  ;;  %v387_v20 = vmax.f32 %v383_v16, 0.0  ;;  %v388_v21 = vmax.f32 %v384_v17, 0.0  ;;  %v389_v22 = vmax.f32 %v385_v18, 0.0 }
 0x238   :  { %v390_v23 = vpack.c.bf16 %v387_v20, %v386_v19  ;;  %v391_v24 = vpack.c.bf16 %v389_v22, %v388_v21 }
 0x23a   :  { %535 = vmatmul.mubr.bf16.vlgmr.msra.gmra.mrb[4].mxu1 %v390_v23 }
 0x23b   :  { %544 = vmatprep.mubr.bf16.mxu1 %v912_v0 }
 0x242   :  { %545 = vmatmul.mubr.bf16.gmra.mrb[8].mxu1 %v391_v24 }
 0x30d   :  { %v536_v28 = vpop.f32.mrb[4].mxu1 }
 0x30e   :  { %v537_v31 = vadd.f32 %v536_v28, %v415_v26  ;;  %v538_v33 = vpop.f32.mrb[5].mxu1 }
 0x30f   :  { %v539_v34 = vadd.f32 %v538_v33, %v419_v27  ;;  %v540_v35 = vpop.f32.mrb[6].mxu1 }
 0x310   :  { %v541_v36 = vadd.f32 %v540_v35, %v415_v26  ;;  %v542_v37 = vpop.f32.mrb[7].mxu1 }
 0x311   :  { %v557_v38 = vsub.f32 %v537_v31, %v539_v34  ;;  %v543_v0 = vadd.f32 %v542_v37, %v419_v27 }
 0x313   :  { %v555_v39 = vpack.c.bf16 %v543_v0, %v539_v34  ;;  %v558_v40 = vsub.f32 %v541_v36, %v543_v0  ;;  %v561_v51 = vmul.f32 %v557_v38, %v1043_v12  ;;  %v743_v34 = vld [vmem:[%s1099_s5 + $0x1] ss:$0 sm:$0xff]  ;;  %s878_s5 = scalar_lea.vmem %s689_s30, 512 }
 0x314   :  { %v745_v0 = vld [vmem:[%s1100_s6 + $0x1] ss:$0 sm:$0xff]  ;;  %p879_p2 = scmp.ne.s32.totalorder %s689_s30, %s878_s5  ;;  %p884_p4 = scmp.lt.s32.totalorder %s878_s5, %s878_s5 }
 0x315   :  { %v546_v41 = vpop.f32.mrb[8].mxu1  ;;  %762 = vmatprep.subr.bf16.mxu0 %v555_v39  ;;  %v562_v58 = vmul.f32 %v558_v40, %v1047_v14 }
 0x316   :  { %v547_v42 = vadd.f32 %v546_v41, %v415_v26  ;;  %v548_v43 = vpop.f32.mrb[9].mxu1  ;;  %763 = vmatpush3.bf16.msra.mxu0 %v555_v39  ;;  %p885_p5 = por %p884_p4, %p883_p3 }
 0x317   :  { %v549_v30 = vadd.f32 %v548_v43, %v419_v27  ;;  %v550_v44 = vpop.f32.mrb[10].mxu1 }
 0x318   :  { %v551_v29 = vadd.f32 %v550_v44, %v415_v26  ;;  %v552_v32 = vpop.f32.mrb[11].mxu1  ;;  %p886_p6 = pnand %p885_p5, %p879_p2 }
 0x319   :  { %v559_v45 = vsub.f32 %v547_v42, %v549_v30  ;;  %v553_v46 = vadd.f32 %v552_v32, %v419_v27 }
 0x31b   :  { %v556_v47 = vpack.c.bf16 %v553_v46, %v549_v30  ;;  %v560_v48 = vsub.f32 %v551_v29, %v553_v46  ;;  %v563_v49 = vmul.f32 %v559_v45, %v1041_v11 }
 0x31d   :  { %764 = vmatprep.subr.bf16.mxu0 %v556_v47  ;;  %v564_v54 = vmul.f32 %v560_v48, %v1045_v13 }
 0x31e   :  { %765 = vmatpush3.bf16.msra.mxu0 %v556_v47 }
 0x321   :  { %767 = vmatmul.mubr.msk.bf16.vlgmr.msra.gmra.mrb[8].mxu0 %vm271_vm0, %v1036_v57 }
 0x3f4   :  { %v768_v50 = vpop.f32.mrb[8].mxu0 }
 0x3f5   :  { %v608_v52 = vadd.f32 %v768_v50, %v563_v49  ;;  %v599_v53 = vpop.f32.mrb[9].mxu0 }
 0x3f6   :  { %v600_v55 = vadd.f32 %v599_v53, %v561_v51  ;;  %v769_v56 = vpop.f32.mrb[10].mxu0 }
 0x3f7   :  { %v611_v59 = vadd.f32 %v769_v56, %v564_v54  ;;  %v602_v60 = vpop.f32.mrb[11].mxu0  ;;  %v616_v57 = vmul.f32 %v608_v52, %v608_v52 }
 0x3f8   :  { %v603_v61 = vadd.f32 %v602_v60, %v562_v58  ;;  %v614_v62 = vmul.f32 %v600_v55, %v600_v55 }
 0x3f9   :  { %v617_v3 = vmul.f32 %v611_v59, %v611_v59 }
 0x3fa   :  { %v615_v63 = vmul.f32 %v603_v61, %v603_v61  ;;  %v618_v1 = vadd.f32 %v603_v61, %v600_v55 }
 0x3fc   :  { %v619_v2 = vadd.f32 %v618_v1, %v608_v52  ;;  %v627_v11 = vadd.f32 %v615_v63, %v614_v62 }
 0x3fe   :  { %v620_v4 = vadd.f32 %v619_v2, %v611_v59  ;;  %v628_v12 = vadd.f32 %v627_v11, %v616_v57 }
 0x400   :  { %v621_v5 = vrot.slane %v620_v4, 4  ;;  %v629_v6 = vadd.f32 %v628_v12, %v617_v3 }
 0x402   :  { %v622_v7 = vadd.f32 %v621_v5, %v620_v4  ;;  %v630_v13 = vrot.slane %v629_v6, 4 }
 0x404   :  { %v623_v8 = vrot.slane %v622_v7, 2  ;;  %v631_v9 = vadd.f32 %v630_v13, %v629_v6 }
 0x406   :  { %v624_v10 = vadd.f32 %v623_v8, %v622_v7  ;;  %v632_v14 = vrot.slane %v631_v9, 2 }
 0x408   :  { %v625_v15 = vrot.slane %v624_v10, 1  ;;  %v633_v16 = vadd.f32 %v632_v14, %v631_v9 }
 0x40a   :  { %v626_v17 = vadd.f32 %v625_v15, %v624_v10  ;;  %v634_v18 = vrot.slane %v633_v16, 1 }
 0x40c   :  { %v635_v19 = vadd.f32 %v634_v18, %v633_v16  ;;  %v636_v20 = vmul.f32 0.03125, %v626_v17 }
 0x40e   :  { %v637_v21 = vmul.f32 0.03125, %v635_v19  ;;  %v638_v22 = vmul.f32 %v636_v20, %v636_v20  ;;  %v642_v23 = vsub.f32 %v603_v61, %v636_v20  ;;  %v641_v24 = vsub.f32 %v600_v55, %v636_v20 }
 0x40f   :  { %v643_v25 = vsub.f32 %v608_v52, %v636_v20  ;;  %v644_v26 = vsub.f32 %v611_v59, %v636_v20 }
 0x410   :  { %v639_v27 = vsub.f32 %v637_v21, %v638_v22 }
 0x412   :  { %v640_v28 = vmax.f32 %v639_v27, 0.0 }
 0x414   :  { %v645_v31 = vadd.f32 1e-05, %v640_v28 }
 0x416   :  { %832 = vrsqrt.f32 %v645_v31 }
 0x420   :  { %v833_v33 = vpop.eup %832 }
 0x421   :  { %v648_v35 = vmul.f32 %v833_v33, %v642_v23  ;;  %v647_v36 = vmul.f32 %v833_v33, %v641_v24  ;;  %v649_v37 = vmul.f32 %v833_v33, %v643_v25  ;;  %v650_v38 = vmul.f32 %v833_v33, %v644_v26 }
 0x423   :  { %v660_v39 = vmul.f32 %v743_v34, %v648_v35  ;;  %v659_v40 = vmul.f32 %v743_v34, %v647_v36  ;;  %v661_v41 = vmul.f32 %v743_v34, %v649_v37  ;;  %v662_v42 = vmul.f32 %v743_v34, %v650_v38 }
 0x425   :  { %v671_v43 = vadd.f32 %v745_v0, %v659_v40  ;;  %v672_v30 = vadd.f32 %v745_v0, %v660_v39  ;;  %v673_v44 = vadd.f32 %v745_v0, %v661_v41  ;;  %v674_v29 = vadd.f32 %v745_v0, %v662_v42 }
 0x427   :  { %v675_v32 = vmax.f32 %v671_v43, 0.0  ;;  %v676_v45 = vmax.f32 %v672_v30, 0.0  ;;  %v677_v46 = vmax.f32 %v673_v44, 0.0  ;;  %v678_v47 = vmax.f32 %v674_v29, 0.0 }
 0x429   :  { %679 = vst [vmem:[#allocation7] sm:$0xff] %v675_v32  ;;  %680 = vst [vmem:[#allocation7 + $0x8] sm:$0xff] %v676_v45 }
 0x42a   :  { %681 = vst [vmem:[#allocation7 + $0x10] sm:$0xff] %v677_v46  ;;  %682 = vst [vmem:[#allocation7 + $0x18] sm:$0xff] %v678_v47 }
 0x42b   :  { %889 = shalt.err (!%p886_p6)
}
 0x42c   :  { %s890_s9 = scalar_lea.hbm %s1101_s7, 512 }
 0x42d   :  { %p891_p7 = scmp.ne.s32.totalorder %s1101_s7, %s890_s9  ;;  %p894_p8 = scmp.lt.u32.totalorder %s890_s9, %s1101_s7 }
 0x42f   :  { %p896_p9 = pnand %p894_p8, %p891_p7 }
 0x431   :  { %899 = shalt.err (!%p896_p9)
}
 0x432   :  { %694 = dma.vmem_to_hbm [thread:$0]  %s689_s30, 512, %s1101_s7, [#allocation4], %s910_s1, %s910_s1, %s911_s25  }
 0x433   :  { %904 = dma.done.wait [#allocation4], 512  }
 0x434   :  { %905 = vsyncadd [#allocation4], 4294966784 }
 0x435   :  { %698 = vsyncpa [#allocation3], 1 }
 0x436   :  { %699 = vsyncpa [#allocation6], 1 }
 0x437   :  { %700 = vsyncpa [#allocation4], 1 }

</bundles_post_ra>
